<compile_context>
chip_gen: v7x
topology: tpu7x:2x2x1
jax: 0.10.0
libtpu: 0.0.40
codegen_flags: <defaults>
</compile_context>

<pallas_src>
import functools

import jax
import jax.numpy as jnp
from jax.experimental import pallas as pl
from jax.experimental.pallas import tpu as pltpu

LANES = 128            # vreg lane width (last dim of every tile)
MAX_TILE_ROWS = 2048   # 2048 x 128 x f32 = 1 MiB per input block
NCORES = 2             # leading "parallel" grid axis (2 TCs on v7x; sequential elsewhere)
_NEG = -1e9            # sigmoid(_NEG) == 0 -> padding contributes nothing


def _fold(v):
    """(R, LANES) -> (8, LANES): sum vreg-aligned row groups (pure VPU adds, no XLU)."""
    return jnp.sum(v.reshape(-1, 8, LANES), axis=0)


def _dice_partials_kernel(x_ref, t_ref, out_ref, *, rows_valid, tile_rows, tiles_per_core):
    """Grid = (NCORES, tiles_per_core); axis 0 parallel, axis 1 arbitrary (reduction).

    out_ref block (1, 3, 8, LANES) stays resident across the reduction axis and holds
    per-lane partials of [sigmoid(x)*t, sigmoid(x), t] for this core.
    """
    c = pl.program_id(0)
    i = pl.program_id(1)

    @pl.when(i == 0)
    def _():
        out_ref[...] = jnp.zeros_like(out_ref)

    p = jax.nn.sigmoid(x_ref[...].astype(jnp.float32))
    t = t_ref[...].astype(jnp.float32)

    row_start = (c * tiles_per_core + i) * tile_rows
    full_tile = row_start + tile_rows <= rows_valid

    @pl.when(full_tile)
    def _():  # fast path: no masking work at all
        out_ref[0, 0] += _fold(p * t)
        out_ref[0, 1] += _fold(p)
        out_ref[0, 2] += _fold(t)

    @pl.when(jnp.logical_not(full_tile))
    def _():  # ragged last tile / overflow tile: row mask (jnp.where is NaN-safe vs garbage)
        ridx = row_start + jax.lax.broadcasted_iota(jnp.int32, p.shape, 0)
        valid = ridx < rows_valid
        pm = jnp.where(valid, p, 0.0)
        tm = jnp.where(valid, t, 0.0)
        out_ref[0, 0] += _fold(pm * tm)
        out_ref[0, 1] += _fold(pm)
        out_ref[0, 2] += _fold(tm)


def dice_loss(inputs, targets, smooth_size=1.0):
    """Pallas equivalent of DiceLoss.forward(inputs, targets, smooth_size)."""
    total = inputs.size
    assert targets.size == total

    x = inputs.reshape(-1)   # row-major flatten: free
    t = targets.reshape(-1)

    # Pad only when the flat length is not already a (>=8) x 128 slab (rare for NCHW).
    # x pad -> sigmoid == 0, t pad -> 0, so padded elements contribute exactly nothing.
    rows = max(8, pl.cdiv(total, LANES))
    padded = rows * LANES
    if padded != total:
        x = jnp.pad(x, (0, padded - total), constant_values=_NEG)
        t = jnp.pad(t, (0, padded - total), constant_values=0)
    x = x.reshape(rows, LANES)
    t = t.reshape(rows, LANES)

    tile_rows = MAX_TILE_ROWS if rows >= MAX_TILE_ROWS else (rows // 8) * 8
    n_tiles = pl.cdiv(rows, tile_rows)
    tiles_per_core = pl.cdiv(n_tiles, NCORES)

    def in_map(c, i):
        # Clamp so the block index is always in range; duplicate/overflow tiles are
        # zeroed by the in-kernel row mask (row_start >= rows_valid => all-false mask).
        return (jnp.minimum(c * tiles_per_core + i, n_tiles - 1), 0)

    kernel = functools.partial(
        _dice_partials_kernel,
        rows_valid=int(rows),
        tile_rows=int(tile_rows),
        tiles_per_core=int(tiles_per_core),
    )

    partials = pl.pallas_call(
        kernel,
        out_shape=jax.ShapeDtypeStruct((NCORES, 3, 8, LANES), jnp.float32),
        grid_spec=pltpu.PrefetchScalarGridSpec(
            num_scalar_prefetch=0,
            grid=(NCORES, tiles_per_core),
            in_specs=[
                pl.BlockSpec((tile_rows, LANES), in_map),
                pl.BlockSpec((tile_rows, LANES), in_map),
            ],
            out_specs=pl.BlockSpec((1, 3, 8, LANES), lambda c, i: (c, 0, 0, 0)),
        ),
        compiler_params=pltpu.CompilerParams(
            dimension_semantics=("parallel", "arbitrary"),
            vmem_limit_bytes=32 * 1024 * 1024,
        ),
    )(x, t)

    # Finish the (tiny) cross-lane reduction and the dice formula in plain JAX:
    # keeps smooth_size out of the kernel and trivially combines the per-core partials.
    intersection = jnp.sum(partials[:, 0])
    sum_p = jnp.sum(partials[:, 1])
    sum_t = jnp.sum(partials[:, 2])
    dice = (2.0 * intersection + smooth_size) / (sum_p + sum_t + smooth_size)
    return 1.0 - dice


def dice_loss_ref(inputs, targets, smooth_size=1.0):
    """Pure-JAX reference matching the PyTorch forward exactly."""
    p = jax.nn.sigmoid(inputs.astype(jnp.float32)).reshape(-1)
    t = targets.astype(jnp.float32).reshape(-1)
    inter = jnp.sum(p * t)
    dice = (2.0 * inter + smooth_size) / (jnp.sum(p) + jnp.sum(t) + smooth_size)
    return 1.0 - dice


if __name__ == "__main__":
    key = jax.random.PRNGKey(0)
    k1, k2 = jax.random.split(key)

    # Primary example: NCHW, same convention as the PyTorch module.
    inputs = jax.random.normal(k1, (2, 4, 16, 16), dtype=jnp.float32)
    targets = (jax.random.uniform(k2, (2, 4, 16, 16)) > 0.5).astype(jnp.float32)

    loss = dice_loss(inputs, targets, smooth_size=1.0)
    jax.block_until_ready(loss)
    ref = dice_loss_ref(inputs, targets, smooth_size=1.0)
    assert jnp.allclose(loss, ref, atol=1e-4, rtol=1e-4), (loss, ref)

    # Extra checks: lane-pad path, ragged last-row tile, and multi-tile MAX_TILE_ROWS path.
    extra_cases = (
        ((2, 3, 17, 19), 1.0),    # total not a multiple of 128 -> sentinel lane pad
        ((2, 5, 16, 16), 0.5),    # rows=20, tile=16 -> masked ragged last tile
        ((8, 16, 64, 80), 1.0),   # rows=5120 -> 2048-row tiles, both cores, masked tail
    )
    for idx, (shape, smooth) in enumerate(extra_cases):
        ka, kb = jax.random.split(jax.random.PRNGKey(idx + 1))
        xs = jax.random.normal(ka, shape, dtype=jnp.float32)
        ts = (jax.random.uniform(kb, shape) > 0.5).astype(jnp.float32)
        got = dice_loss(xs, ts, smooth_size=smooth)
        jax.block_until_ready(got)
        want = dice_loss_ref(xs, ts, smooth_size=smooth)
        assert jnp.allclose(got, want, atol=1e-4, rtol=1e-4), (shape, got, want)

    print("KERNEL_OK")
</pallas_src>

<mosaic_0001>
module attributes {stable_mosaic.version = 11 : i64} {
  func.func @_dice_partials_kernel(%arg0: i32, %arg1: i32, %arg2: memref<16x128xf32, #tpu.memory_space<vmem>>, %arg3: memref<16x128xf32, #tpu.memory_space<vmem>>, %arg4: memref<1x3x8x128xf32, #tpu.memory_space<vmem>>) attributes {dimension_semantics = [#tpu.dimension_semantics<parallel>, #tpu.dimension_semantics<arbitrary>], iteration_bounds = array<i64: 2, 1>, scalar_prefetch = 0 : i64, scratch_operands = 0 : i64, tpu.core_type = #tpu.core_type<tc>, window_params = [{transform_indices = @transform_0, window_bounds = array<i64: 16, 128>}, {transform_indices = @transform_1, window_bounds = array<i64: 16, 128>}, {transform_indices = @transform_2, window_bounds = array<i64: 1, 3, 8, 128>}]} {
    %c0_i32 = arith.constant 0 : i32
    %0 = arith.cmpi eq, %arg1, %c0_i32 : i32
    %1 = arith.extui %0 : i1 to i32
    %c0_i32_0 = arith.constant 0 : i32
    %2 = arith.cmpi ne, %1, %c0_i32_0 : i32
    scf.if %2 {
      %cst_8 = arith.constant 0.000000e+00 : f32
      %20 = vector.broadcast %cst_8 : f32 to vector<1x3x8x128xf32>
      %c0_9 = arith.constant 0 : index
      %c0_10 = arith.constant 0 : index
      %c0_11 = arith.constant 0 : index
      %c0_12 = arith.constant 0 : index
      %21 = vector.load %arg4[%c0_9, %c0_10, %c0_11, %c0_12] : memref<1x3x8x128xf32, #tpu.memory_space<vmem>>, vector<1x3x8x128xf32>
      tpu.vector_store %arg4[%c0_9, %c0_10, %c0_11, %c0_12], %20 {strides = array<i32>} : memref<1x3x8x128xf32, #tpu.memory_space<vmem>>, vector<1x3x8x128xf32>,
    } else {
    }
    %c0 = arith.constant 0 : index
    %c0_1 = arith.constant 0 : index
    %3 = vector.load %arg2[%c0, %c0_1] : memref<16x128xf32, #tpu.memory_space<vmem>>, vector<16x128xf32>
    %4 = arith.negf %3 : vector<16x128xf32>
    %5 = math.exp %4 : vector<16x128xf32>
    %cst = arith.constant 1.000000e+00 : f32
    %6 = vector.broadcast %cst : f32 to vector<16x128xf32>
    %7 = arith.addf %6, %5 : vector<16x128xf32>
    %8 = arith.divf %6, %7 : vector<16x128xf32>
    %c0_2 = arith.constant 0 : index
    %c0_3 = arith.constant 0 : index
    %9 = vector.load %arg3[%c0_2, %c0_3] : memref<16x128xf32, #tpu.memory_space<vmem>>, vector<16x128xf32>
    %c1_i32 = arith.constant 1 : i32
    %10 = arith.muli %arg0, %c1_i32 : i32
    %11 = arith.addi %10, %arg1 : i32
    %c16_i32 = arith.constant 16 : i32
    %12 = arith.muli %11, %c16_i32 : i32
    %c16_i32_4 = arith.constant 16 : i32
    %13 = arith.addi %12, %c16_i32_4 : i32
    %c16_i32_5 = arith.constant 16 : i32
    %14 = arith.cmpi sle, %13, %c16_i32_5 : i32
    %15 = arith.extui %14 : i1 to i32
    %c0_i32_6 = arith.constant 0 : i32
    %16 = arith.cmpi ne, %15, %c0_i32_6 : i32
    scf.if %16 {
      %c0_8 = arith.constant 0 : index
      %c0_9 = arith.constant 0 : index
      %c0_10 = arith.constant 0 : index
      %c0_11 = arith.constant 0 : index
      %20 = vector.load %arg4[%c0_8, %c0_9, %c0_10, %c0_11] : memref<1x3x8x128xf32, #tpu.memory_space<vmem>>, vector<1x1x8x128xf32>
      %21 = vector.shape_cast %20 : vector<1x1x8x128xf32> to vector<8x128xf32>
      %22 = arith.mulf %8, %9 : vector<16x128xf32>
      %23 = vector.shape_cast %22 : vector<16x128xf32> to vector<2x8x128xf32>
      %cst_12 = arith.constant dense<0.000000e+00> : vector<8x128xf32>
      %24 = vector.multi_reduction <add>, %23, %cst_12 [0] : vector<2x8x128xf32> to vector<8x128xf32>
      %25 = arith.addf %21, %24 : vector<8x128xf32>
      %c0_13 = arith.constant 0 : index
      %c0_14 = arith.constant 0 : index
      %c0_15 = arith.constant 0 : index
      %c0_16 = arith.constant 0 : index
      %26 = vector.load %arg4[%c0_13, %c0_14, %c0_15, %c0_16] : memref<1x3x8x128xf32, #tpu.memory_space<vmem>>, vector<1x1x8x128xf32>
      %27 = vector.shape_cast %26 : vector<1x1x8x128xf32> to vector<8x128xf32>
      %28 = vector.shape_cast %25 : vector<8x128xf32> to vector<1x1x8x128xf32>
      tpu.vector_store %arg4[%c0_13, %c0_14, %c0_15, %c0_16], %28 {strides = array<i32>} : memref<1x3x8x128xf32, #tpu.memory_space<vmem>>, vector<1x1x8x128xf32>,
      %c0_17 = arith.constant 0 : index
      %c1 = arith.constant 1 : index
      %c0_18 = arith.constant 0 : index
      %c0_19 = arith.constant 0 : index
      %29 = vector.load %arg4[%c0_17, %c1, %c0_18, %c0_19] : memref<1x3x8x128xf32, #tpu.memory_space<vmem>>, vector<1x1x8x128xf32>
      %30 = vector.shape_cast %29 : vector<1x1x8x128xf32> to vector<8x128xf32>
      %31 = vector.shape_cast %8 : vector<16x128xf32> to vector<2x8x128xf32>
      %cst_20 = arith.constant dense<0.000000e+00> : vector<8x128xf32>
      %32 = vector.multi_reduction <add>, %31, %cst_20 [0] : vector<2x8x128xf32> to vector<8x128xf32>
      %33 = arith.addf %30, %32 : vector<8x128xf32>
      %c0_21 = arith.constant 0 : index
      %c1_22 = arith.constant 1 : index
      %c0_23 = arith.constant 0 : index
      %c0_24 = arith.constant 0 : index
      %34 = vector.load %arg4[%c0_21, %c1_22, %c0_23, %c0_24] : memref<1x3x8x128xf32, #tpu.memory_space<vmem>>, vector<1x1x8x128xf32>
      %35 = vector.shape_cast %34 : vector<1x1x8x128xf32> to vector<8x128xf32>
      %36 = vector.shape_cast %33 : vector<8x128xf32> to vector<1x1x8x128xf32>
      tpu.vector_store %arg4[%c0_21, %c1_22, %c0_23, %c0_24], %36 {strides = array<i32>} : memref<1x3x8x128xf32, #tpu.memory_space<vmem>>, vector<1x1x8x128xf32>,
      %c0_25 = arith.constant 0 : index
      %c2 = arith.constant 2 : index
      %c0_26 = arith.constant 0 : index
      %c0_27 = arith.constant 0 : index
      %37 = vector.load %arg4[%c0_25, %c2, %c0_26, %c0_27] : memref<1x3x8x128xf32, #tpu.memory_space<vmem>>, vector<1x1x8x128xf32>
      %38 = vector.shape_cast %37 : vector<1x1x8x128xf32> to vector<8x128xf32>
      %39 = vector.shape_cast %9 : vector<16x128xf32> to vector<2x8x128xf32>
      %cst_28 = arith.constant dense<0.000000e+00> : vector<8x128xf32>
      %40 = vector.multi_reduction <add>, %39, %cst_28 [0] : vector<2x8x128xf32> to vector<8x128xf32>
      %41 = arith.addf %38, %40 : vector<8x128xf32>
      %c0_29 = arith.constant 0 : index
      %c2_30 = arith.constant 2 : index
      %c0_31 = arith.constant 0 : index
      %c0_32 = arith.constant 0 : index
      %42 = vector.load %arg4[%c0_29, %c2_30, %c0_31, %c0_32] : memref<1x3x8x128xf32, #tpu.memory_space<vmem>>, vector<1x1x8x128xf32>
      %43 = vector.shape_cast %42 : vector<1x1x8x128xf32> to vector<8x128xf32>
      %44 = vector.shape_cast %41 : vector<8x128xf32> to vector<1x1x8x128xf32>
      tpu.vector_store %arg4[%c0_29, %c2_30, %c0_31, %c0_32], %44 {strides = array<i32>} : memref<1x3x8x128xf32, #tpu.memory_space<vmem>>, vector<1x1x8x128xf32>,
    } else {
    }
    %true = arith.constant true
    %17 = arith.xori %14, %true : i1
    %18 = arith.extui %17 : i1 to i32
    %c0_i32_7 = arith.constant 0 : i32
    %19 = arith.cmpi ne, %18, %c0_i32_7 : i32
    scf.if %19 {
      %20 = tpu.iota {dimensions = array<i32: 0>} : vector<16x128xi32>
      %21 = vector.broadcast %12 : i32 to vector<16x128xi32>
      %22 = arith.addi %21, %20 : vector<16x128xi32>
      %c16_i32_8 = arith.constant 16 : i32
      %23 = vector.broadcast %c16_i32_8 : i32 to vector<16x128xi32>
      %24 = arith.cmpi slt, %22, %23 : vector<16x128xi32>
      %cst_9 = arith.constant 0.000000e+00 : f32
      %25 = vector.broadcast %cst_9 : f32 to vector<16x128xf32>
      %26 = arith.select %24, %8, %25 : vector<16x128xi1>, vector<16x128xf32>
      %cst_10 = arith.constant 0.000000e+00 : f32
      %27 = vector.broadcast %cst_10 : f32 to vector<16x128xf32>
      %28 = arith.select %24, %9, %27 : vector<16x128xi1>, vector<16x128xf32>
      %c0_11 = arith.constant 0 : index
      %c0_12 = arith.constant 0 : index
      %c0_13 = arith.constant 0 : index
      %c0_14 = arith.constant 0 : index
      %29 = vector.load %arg4[%c0_11, %c0_12, %c0_13, %c0_14] : memref<1x3x8x128xf32, #tpu.memory_space<vmem>>, vector<1x1x8x128xf32>
      %30 = vector.shape_cast %29 : vector<1x1x8x128xf32> to vector<8x128xf32>
      %31 = arith.mulf %26, %28 : vector<16x128xf32>
      %32 = vector.shape_cast %31 : vector<16x128xf32> to vector<2x8x128xf32>
      %cst_15 = arith.constant dense<0.000000e+00> : vector<8x128xf32>
      %33 = vector.multi_reduction <add>, %32, %cst_15 [0] : vector<2x8x128xf32> to vector<8x128xf32>
      %34 = arith.addf %30, %33 : vector<8x128xf32>
      %c0_16 = arith.constant 0 : index
      %c0_17 = arith.constant 0 : index
      %c0_18 = arith.constant 0 : index
      %c0_19 = arith.constant 0 : index
      %35 = vector.load %arg4[%c0_16, %c0_17, %c0_18, %c0_19] : memref<1x3x8x128xf32, #tpu.memory_space<vmem>>, vector<1x1x8x128xf32>
      %36 = vector.shape_cast %35 : vector<1x1x8x128xf32> to vector<8x128xf32>
      %37 = vector.shape_cast %34 : vector<8x128xf32> to vector<1x1x8x128xf32>
      tpu.vector_store %arg4[%c0_16, %c0_17, %c0_18, %c0_19], %37 {strides = array<i32>} : memref<1x3x8x128xf32, #tpu.memory_space<vmem>>, vector<1x1x8x128xf32>,
      %c0_20 = arith.constant 0 : index
      %c1 = arith.constant 1 : index
      %c0_21 = arith.constant 0 : index
      %c0_22 = arith.constant 0 : index
      %38 = vector.load %arg4[%c0_20, %c1, %c0_21, %c0_22] : memref<1x3x8x128xf32, #tpu.memory_space<vmem>>, vector<1x1x8x128xf32>
      %39 = vector.shape_cast %38 : vector<1x1x8x128xf32> to vector<8x128xf32>
      %40 = vector.shape_cast %26 : vector<16x128xf32> to vector<2x8x128xf32>
      %cst_23 = arith.constant dense<0.000000e+00> : vector<8x128xf32>
      %41 = vector.multi_reduction <add>, %40, %cst_23 [0] : vector<2x8x128xf32> to vector<8x128xf32>
      %42 = arith.addf %39, %41 : vector<8x128xf32>
      %c0_24 = arith.constant 0 : index
      %c1_25 = arith.constant 1 : index
      %c0_26 = arith.constant 0 : index
      %c0_27 = arith.constant 0 : index
      %43 = vector.load %arg4[%c0_24, %c1_25, %c0_26, %c0_27] : memref<1x3x8x128xf32, #tpu.memory_space<vmem>>, vector<1x1x8x128xf32>
      %44 = vector.shape_cast %43 : vector<1x1x8x128xf32> to vector<8x128xf32>
      %45 = vector.shape_cast %42 : vector<8x128xf32> to vector<1x1x8x128xf32>
      tpu.vector_store %arg4[%c0_24, %c1_25, %c0_26, %c0_27], %45 {strides = array<i32>} : memref<1x3x8x128xf32, #tpu.memory_space<vmem>>, vector<1x1x8x128xf32>,
      %c0_28 = arith.constant 0 : index
      %c2 = arith.constant 2 : index
      %c0_29 = arith.constant 0 : index
      %c0_30 = arith.constant 0 : index
      %46 = vector.load %arg4[%c0_28, %c2, %c0_29, %c0_30] : memref<1x3x8x128xf32, #tpu.memory_space<vmem>>, vector<1x1x8x128xf32>
      %47 = vector.shape_cast %46 : vector<1x1x8x128xf32> to vector<8x128xf32>
      %48 = vector.shape_cast %28 : vector<16x128xf32> to vector<2x8x128xf32>
      %cst_31 = arith.constant dense<0.000000e+00> : vector<8x128xf32>
      %49 = vector.multi_reduction <add>, %48, %cst_31 [0] : vector<2x8x128xf32> to vector<8x128xf32>
      %50 = arith.addf %47, %49 : vector<8x128xf32>
      %c0_32 = arith.constant 0 : index
      %c2_33 = arith.constant 2 : index
      %c0_34 = arith.constant 0 : index
      %c0_35 = arith.constant 0 : index
      %51 = vector.load %arg4[%c0_32, %c2_33, %c0_34, %c0_35] : memref<1x3x8x128xf32, #tpu.memory_space<vmem>>, vector<1x1x8x128xf32>
      %52 = vector.shape_cast %51 : vector<1x1x8x128xf32> to vector<8x128xf32>
      %53 = vector.shape_cast %50 : vector<8x128xf32> to vector<1x1x8x128xf32>
      tpu.vector_store %arg4[%c0_32, %c2_33, %c0_34, %c0_35], %53 {strides = array<i32>} : memref<1x3x8x128xf32, #tpu.memory_space<vmem>>, vector<1x1x8x128xf32>,
    } else {
    }
    return
  }
  func.func @transform_0(%arg0: i32, %arg1: i32) -> (i32, i32) {
    %c1_i32 = arith.constant 1 : i32
    %0 = arith.muli %arg0, %c1_i32 : i32
    %1 = arith.addi %0, %arg1 : i32
    %c0_i32 = arith.constant 0 : i32
    %2 = arith.minsi %1, %c0_i32 : i32
    %c0_i32_0 = arith.constant 0 : i32
    %c0_i32_1 = arith.constant 0 : i32
    return %2, %c0_i32_0 : i32, i32
  }
  func.func @transform_1(%arg0: i32, %arg1: i32) -> (i32, i32) {
    %c1_i32 = arith.constant 1 : i32
    %0 = arith.muli %arg0, %c1_i32 : i32
    %1 = arith.addi %0, %arg1 : i32
    %c0_i32 = arith.constant 0 : i32
    %2 = arith.minsi %1, %c0_i32 : i32
    %c0_i32_0 = arith.constant 0 : i32
    %c0_i32_1 = arith.constant 0 : i32
    return %2, %c0_i32_0 : i32, i32
  }
  func.func @transform_2(%arg0: i32, %arg1: i32) -> (i32, i32, i32, i32) {
    %c0_i32 = arith.constant 0 : i32
    %c0_i32_0 = arith.constant 0 : i32
    %c0_i32_1 = arith.constant 0 : i32
    %c0_i32_2 = arith.constant 0 : i32
    return %arg0, %c0_i32, %c0_i32_0, %c0_i32_1 : i32, i32, i32, i32
  }
}

</mosaic_0001>

<bundles_post_ra>
// kernel: tpu_custom_call.1
= control target key start
LH: loop header
LB: loop body
LE: loop exit
PB: predicated region body
PF: predicated region fallthrough
CT: control target
= control target key end

     0   :  { %7 = vsyncpa [#allocation3], 0  ;;  %s1002_s0 = inlined_call_operand.hbm [shape: f32[16,128], index: 0, kind: input, shape index: {}]   ;;  %s1003_s1 = inlined_call_operand.hbm [shape: f32[16,128], index: 1, kind: input, shape index: {}]   ;;  %s1004_s2 = inlined_call_operand.hbm [shape: f32[2,3,8,128], index: 2, kind: output, shape index: {}]  }
   0x1   :  { %9 = vsyncpa [#allocation3 + $0x1], 0 }
   0x2   :  { %10 = vsyncpa [#allocation6], 0 }
   0x3   :  { %12 = vsyncpa [#allocation6 + $0x1], 0 }
   0x4   :  { %13 = vsyncpa [#allocation4], 0 }
   0x5   :  { %15 = vsyncpa [#allocation4 + $0x1], 0  ;;  %s765_s9 = smov 0   ;;  %s767_s10 = smov 0  }
   0x6   :  { %s769_s11 = smov 0   ;;  %s771_s12 = smov 0  }
   0x7   :  { %s773_s13 = smov 0   ;;  %s775_s14 = smov 0  }
   0x8   :  { %s777_s15 = smov 0   ;;  %s779_s16 = smov 0  }
   0x9 LB: > { %s436_s17 = sadd.s32 4294967295, %s740_s16   ;;  %s437_s18 = sadd.s32 4294967294, %s740_s16   ;;  %s740_s16 = sphi %s779_s16, %s21_s16   ;;  %s736_s15 = sphi %s777_s15, %s1023_s15   ;;  %s732_s14 = sphi %s775_s14, %s1022_s14   ;;  %s728_s13 = sphi %s773_s13, %s992_s13   ;;  %s724_s12 = sphi %s771_s12, %s1021_s12   ;;  %s720_s11 = sphi %s769_s11, %s1020_s11   ;;  %s716_s10 = sphi %s767_s10, %s1019_s10   ;;  %s712_s9 = sphi %s765_s9, %s1018_s9  }
   0xa   : > { %s33_s19 = sadd.s32 1, %s736_s15  ;;  %p709_p1 = scmp.ne.s32.totalorder %s728_s13, 0 }
   0xb   : > { %p35_p0 = scmp.ge.s32.totalorder %s33_s19, 2  ;;  %p54_p2 = scmp.eq.s32.totalorder %s740_s16, 0 }
   0xc   : > { %p59_p3 = scmp.ne.s32.totalorder %s728_s13, %s724_s12  ;;  %p60_p5 = scmp.eq.s32.totalorder %s436_s17, 0 }
   0xd   : > { %s1025_s19 = smov (%p35_p0, %s33_s19), 0  ;;  %p811_p4 = por %p709_p1, %p54_p2 }
   0xe   : > { %p815_p6 = por %p60_p5, %p59_p3  ;;  %s101_s22 = ssub.s32 %s736_s15, %s1025_s19 }
   0xf   : > { %p102_p7 = scmp.eq.s32.totalorder %s101_s22, 0  ;;  %s104_s23 = sadd.s32 1, %s720_s11 }
  0x10   : > { %s1008_s21 = scalar_select %p815_p6, 1, 0 }
  0x11   : > { %s823_s24 = scalar_select %p102_p7, %s720_s11, %s104_s23  }
  0x12   : > { %p114_p8 = scmp.ne.s32.totalorder %s720_s11, %s716_s10  ;;  %p115_p9 = scmp.eq.s32.totalorder %s436_s17, 1 }
  0x13   : > { %p120_p10 = scmp.ne.s32.totalorder %s716_s10, %s712_s9  ;;  %p121_p11 = scmp.eq.s32.totalorder %s437_s18, 1 }
  0x14   : > { %p829_p12 = por %p115_p9, %p114_p8  ;;  %p486_p1 = scmp.lt.s32.totalorder %s740_s16, 2 }
  0x15   : > { %p834_p0 = por %p121_p11, %p120_p10  ;;  %s742_s27 = smov [#allocation2]  }
  0x16   : > { %s1009_s25 = scalar_select %p829_p12, 1, 0 }
  0x17   : > { %s1010_s26 = scalar_select %p834_p0, 1, 0 }
  0x18   : > { %s155_s28 = sshll.u32 %s742_s27, 4  ;;  %p841_p2 = pnand %p486_p1, %p811_p4  ;;  %s156_s28 = int_to_ptr.vmem [resolvable:$true] %s155_s28 }
  0x19   : > { %s573_s4 = scalar_lea.hbm %s1002_s0, 256 }
  0x1a   : > { %p574_p3 = scmp.ne.s32.totalorder %s1002_s0, %s573_s4  ;;  %p575_p5 = pneg %p841_p2 }
  0x1b   : > { %p580_p8 = scmp.lt.u32.totalorder %s573_s4, %s573_s4  ;;  %p582_p9 = scmp.lt.u32.totalorder %s573_s4, %s1002_s0 }
  0x1c   : > { %p576_p7 = pnand %p575_p5, %p574_p3 }
  0x1d   : > { %p583_p10 = por %p582_p9, %p580_p8 }
  0x1e   : > { %p577_p4 = pneg %p576_p7 }
  0x20   : > { %p584_p11 = pnand %p583_p10, %p577_p4 }
  0x22   : > { %587 = shalt.err (!%p584_p11)
}
  0x23   : > { %s588_s12 = scalar_lea.vmem %s156_s28, 256  ;;  %s595_s17 = scalar_lea.vmem %s156_s28, 512 }
  0x24   : > { %p589_p1 = scmp.ne.s32.totalorder %s156_s28, %s588_s12  ;;  %p596_p12 = scmp.lt.s32.totalorder %s156_s28, %s156_s28 }
  0x25   : > { %p597_p6 = scmp.lt.s32.totalorder %s595_s17, %s588_s12 }
  0x26   : > { %p591_p13 = pnand %p589_p1, %p575_p5 }
  0x27   : > { %p598_p3 = por %p597_p6, %p596_p12 }
  0x28   : > { %p592_p0 = pneg %p591_p13 }
  0x2a   : > { %p599_p7 = pnand %p598_p3, %p592_p0 }
  0x2c   : > { %602 = shalt.err (!%p599_p7)
}
  0x2d   : > { %s743_s18 = smov 128   ;;  %s744_s20 = smov 8  }
  0x2e   : > { %478 = dma.hbm_to_vmem [thread:$0]  (!%p841_p2), %s1002_s0, 256, %s156_s28, [#allocation3], %s743_s18, %s743_s18, %s744_s20  }
  0x2f   : > { %p446_p13 = scmp.ge.s32.totalorder %s740_s16, 1  ;;  %p187_p4 = scmp.lt.s32.totalorder %s740_s16, 3 }
  0x30   : > { %s745_s30 = smov [#allocation5]   ;;  %s603_s6 = scalar_lea.hbm %s1003_s1, 256 }
  0x31   : > { %p872_p8 = pnand %p446_p13, %p187_p4  ;;  %s179_s3 = sshll.u32 %s745_s30, 4  ;;  %s180_s3 = int_to_ptr.vmem [resolvable:$true] %s179_s3 }
  0x32   : > { %p604_p6 = scmp.ne.s32.totalorder %s1003_s1, %s603_s6  ;;  %p610_p9 = scmp.lt.u32.totalorder %s603_s6, %s603_s6 }
  0x33   : > { %s1012_s27 = scalar_select %p872_p8, 1, 0 }
  0x34   : > { %p606_p12 = pnand %p604_p6, %p575_p5  ;;  %p612_p10 = scmp.lt.u32.totalorder %s603_s6, %s1003_s1 }
  0x36   : > { %p607_p0 = pneg %p606_p12  ;;  %p613_p11 = por %p612_p10, %p610_p9 }
  0x38   : > { %p614_p1 = pnand %p613_p11, %p607_p0 }
  0x3a   : > { %617 = shalt.err (!%p614_p1)
}
  0x3b   : > { %s618_s17 = scalar_lea.vmem %s180_s3, 256  ;;  %s625_s22 = scalar_lea.vmem %s180_s3, 512 }
  0x3c   : > { %p619_p3 = scmp.ne.s32.totalorder %s180_s3, %s618_s17  ;;  %p626_p4 = scmp.lt.s32.totalorder %s180_s3, %s180_s3 }
  0x3d   : > { %p627_p8 = scmp.lt.s32.totalorder %s625_s22, %s618_s17 }
  0x3e   : > { %p621_p7 = pnand %p619_p3, %p575_p5 }
  0x3f   : > { %p628_p6 = por %p627_p8, %p626_p4 }
  0x40   : > { %p622_p13 = pneg %p621_p7 }
  0x42   : > { %p629_p12 = pnand %p628_p6, %p622_p13 }
  0x44   : > { %632 = shalt.err (!%p629_p12)
}
  0x45   : > { %481 = dma.hbm_to_vmem [thread:$0]  (!%p841_p2), %s1003_s1, 256, %s180_s3, [#allocation6], %s743_s18, %s743_s18, %s744_s20  }
  0x46   : > { %p1013_p0 = scmp.ne.s32.totalorder %s1012_s27, 0 }
  0x47   : > { %s193_s4 = sand.u32 (!%p1013_p0), 1, %s728_s13   ;;  %p1014_p5 = scmp.ne.s32.totalorder (!%p1013_p0), %s1008_s21, 0 }
  0x48   : > { %191 = sbr.rel (%p1013_p0) target bundleno = 161 (0xa1), region = 28  ;;  %s447_s5 = sshll.u32 (!%p1013_p0), %s193_s4, 4 }
  0x49   : > { %s194_s6 = scalar_lea.sflag (!%p1013_p0), [#allocation3], %s193_s4  ;;  %s197_s7 = scalar_lea.vmem (!%p1013_p0), [#allocation2], %s447_s5 }
  0x4f   : > { %698 = dma.done.wait (%p1014_p5), %s194_s6, 256  }
  0x50   : > { %700 = vsyncadd (%p1014_p5), %s194_s6, 4294967040  ;;  %s203_s29 = scalar_lea.sflag [#allocation6], %s193_s4  ;;  %s206_s8 = scalar_lea.vmem [#allocation5], %s447_s5 }
  0x51   : > { %702 = dma.done.wait (%p1014_p5), %s203_s29, 256  }
  0x52   : > { %704 = vsyncadd (%p1014_p5), %s203_s29, 4294967040  ;;  %s229_s18 = sand.u32 1, %s716_s10   ;;  %s451_s20 = sshll.u32 %s732_s14, 4  ;;  %v746_v0 = vmov 0.0   ;;  %v247_v1 = vld [vmem:[%s197_s7] sm:$0xff]  ;;  %v248_v2 = vld [vmem:[%s197_s7 + $0x8] sm:$0xff] }
  0x53   : > { %s467_s27 = smul.u32 24, %s229_s18  ;;  %s916_s3 = sadd.s32 16, %s451_s20  ;;  %v261_v3 = vld [vmem:[%s206_s8] sm:$0xff]  ;;  %v449_v4 = vmul.f32 -1.442695, %v247_v1  ;;  %v262_v6 = vld [vmem:[%s206_s8 + $0x8] sm:$0xff] }
  0x54   : > { %v450_v5 = vmul.f32 -1.442695, %v248_v2  ;;  %p452_p2 = scmp.gt.s32.totalorder %s916_s3, 16 }
  0x55   : > { %s918_s28 = scalar_lea.vmem [#allocation7], %s467_s27  ;;  %565 = vpow2.f32 %v449_v4  ;;  %v283_v18 = vadd.f32 (!%p452_p2), %v262_v6, %v261_v3 }
  0x56   : > { %244 = vst [vmem:[%s918_s28] sm:$0xff] %v746_v0  ;;  %245 = vst [vmem:[%s918_s28 + $0x8] sm:$0xff] %v746_v0  ;;  %567 = vpow2.f32 %v450_v5 }
  0x57   : > { %246 = vst [vmem:[%s918_s28 + $0x10] sm:$0xff] %v746_v0 }
  0x5d   : > { %v453_v15 = vld [vmem:[%s918_s28 + $0x8] sm:$0xff] (!%p452_p2)  ;;  %v270_v19 = vld [vmem:[%s918_s28] sm:$0xff] (!%p452_p2) }
  0x5e   : > { %v455_v17 = vld [vmem:[%s918_s28 + $0x10] sm:$0xff] (!%p452_p2) }
  0x5f   : > { %v566_v7 = vpop.eup %565  ;;  %v284_v22 = vadd.f32 (!%p452_p2), %v455_v17, %v283_v18 }
  0x60   : > { %v568_v8 = vpop.eup %567  ;;  %v255_v9 = vadd.f32 1.0, %v566_v7 }
  0x61   : > { %v256_v10 = vadd.f32 1.0, %v568_v8  ;;  %456 = vst [vmem:[%s918_s28 + $0x10] sm:$0xff] (!%p452_p2), %v284_v22 }
  0x62   : > { %569 = vrcp.f32 %v255_v9 }
  0x63   : > { %571 = vrcp.f32 %v256_v10 }
  0x67   : > { %269 = sbr.rel (%p452_p2) target bundleno = 117 (0x75), region = 44 }
  0x6c   : > { %v570_v11 = vpop.eup %569 }
  0x6d   : > { %v572_v12 = vpop.eup %571  ;;  %v271_v13 = vmul.f32 (!%p452_p2), %v570_v11, %v261_v3 }
  0x6e   : > { %v272_v14 = vmul.f32 %v572_v12, %v262_v6  ;;  %v278_v16 = vadd.f32 %v572_v12, %v570_v11 }
  0x70   : > { %v273_v20 = vadd.f32 %v272_v14, %v271_v13  ;;  %v279_v21 = vadd.f32 %v453_v15, %v278_v16 }
  0x72   : > { %v274_v23 = vadd.f32 %v273_v20, %v270_v19  ;;  %454 = vst [vmem:[%s918_s28 + $0x8] sm:$0xff] %v279_v21 }
  0x74   : > { %275 = vst [vmem:[%s918_s28] sm:$0xff] %v274_v23 }
  0x75 PF: > { %p457_p8 = scmp.le.s32.totalorder %s916_s3, 16 }
  0x76   : > { %v290_v24 = vlaneseq (!%p457_p8)  ;;  %v293_v25 = vstv (!%p457_p8), %s451_s20  ;;  %v460_v36 = vld [vmem:[%s918_s28 + $0x10] sm:$0xff] (!%p457_p8) }
  0x77   : > { %289 = sbr.rel (%p457_p8) target bundleno = 135 (0x87), region = 48 }
  0x78   : > { %v291_v26 = vshrl.u32 (!%p457_p8), %v290_v24, 7 }
  0x79   : > { %v458_v35 = vld [vmem:[%s918_s28 + $0x8] sm:$0xff] (!%p457_p8) }
  0x7a   : > { %v292_v27 = vadd.s32 (!%p457_p8), 8, %v291_v26  ;;  %v294_v28 = vadd.s32 (!%p457_p8), %v293_v25, %v291_v26 }
  0x7b   : > { %v302_v40 = vld [vmem:[%s918_s28] sm:$0xff] (!%p457_p8) }
  0x7c   : > { %v295_v29 = vadd.s32 (!%p457_p8), %v293_v25, %v292_v27  ;;  %vm296_vm0 = vcmp.lt.s32.totalorder (!%p457_p8), %v294_v28, 16 }
  0x7d   : > { %v298_v30 = vsel (!%p457_p8), %vm296_vm0, %v570_v11, 0.0  ;;  %v300_v31 = vsel (!%p457_p8), %vm296_vm0, %v261_v3, 0.0 }
  0x7e   : > { %vm297_vm1 = vcmp.lt.s32.totalorder %v295_v29, 16  ;;  %v303_v32 = vmul.f32 %v300_v31, %v298_v30 }
  0x7f   : > { %v299_v33 = vsel %vm297_vm1, %v572_v12, 0.0  ;;  %v301_v34 = vsel %vm297_vm1, %v262_v6, 0.0 }
  0x80   : > { %v304_v37 = vmul.f32 %v301_v34, %v299_v33  ;;  %v310_v38 = vadd.f32 %v299_v33, %v298_v30  ;;  %v315_v39 = vadd.f32 %v301_v34, %v300_v31 }
  0x82   : > { %v305_v41 = vadd.f32 %v304_v37, %v303_v32  ;;  %v311_v42 = vadd.f32 %v458_v35, %v310_v38  ;;  %v316_v43 = vadd.f32 %v460_v36, %v315_v39 }
  0x84   : > { %v306_v44 = vadd.f32 %v305_v41, %v302_v40  ;;  %459 = vst [vmem:[%s918_s28 + $0x8] sm:$0xff] %v311_v42  ;;  %461 = vst [vmem:[%s918_s28 + $0x10] sm:$0xff] %v316_v43 }
  0x86   : > { %307 = vst [vmem:[%s918_s28] sm:$0xff] %v306_v44 }
  0x87 PF: > { %s468_s21 = smul.u32 384, %s732_s14  ;;  %s332_s12 = sshll.u32 %s918_s28, 4  ;;  %s946_s12 = int_to_ptr.vmem [resolvable:$true] %s332_s12 }
  0x88   : > { %s950_s30 = scalar_lea.sflag [#allocation4], %s229_s18  ;;  %s633_s4 = scalar_lea.vmem %s946_s12, 384 }
  0x89   : > { %s944_s23 = scalar_lea.hbm %s1004_s2, %s468_s21  ;;  %p634_p9 = scmp.ne.s32.totalorder %s946_s12, %s633_s4 }
  0x8a   : > { %p1015_p10 = scmp.ne.s32.totalorder %s1009_s25, 0  ;;  %s747_s14 = smov [#allocation7]  }
  0x8b   : > { %s637_s5 = sshll.u32 %s747_s14, 4  ;;  %s638_s5 = int_to_ptr.vmem [resolvable:$false] %s637_s5 }
  0x8c   : > { %p635_p11 = pnand %p634_p9, %p1015_p10  ;;  %s639_s6 = scalar_lea.vmem %s638_s5, 768 }
  0x8d   : > { %p640_p3 = scmp.lt.s32.totalorder %s946_s12, %s638_s5  ;;  %p641_p7 = scmp.lt.s32.totalorder %s639_s6, %s633_s4 }
  0x8e   : > { %p636_p1 = pneg %p635_p11 }
  0x8f   : > { %p642_p13 = por %p641_p7, %p640_p3 }
  0x91   : > { %p643_p4 = pnand %p642_p13, %p636_p1 }
  0x93   : > { %646 = shalt.err (!%p643_p4)
}
  0x94   : > { %s647_s7 = scalar_lea.hbm %s944_s23, 384  ;;  %s651_s18 = scalar_lea.hbm %s1004_s2, 768 }
  0x95   : > { %p648_p6 = scmp.ne.s32.totalorder %s944_s23, %s647_s7  ;;  %p652_p5 = scmp.lt.u32.totalorder %s944_s23, %s1004_s2 }
  0x96   : > { %p653_p2 = scmp.lt.u32.totalorder %s651_s18, %s647_s7  ;;  %p655_p9 = scmp.lt.u32.totalorder %s647_s7, %s944_s23 }
  0x97   : > { %p649_p12 = pnand %p648_p6, %p1015_p10 }
  0x98   : > { %p654_p8 = por %p653_p2, %p652_p5 }
  0x99   : > { %p650_p0 = pneg %p649_p12 }
  0x9a   : > { %p656_p11 = por %p655_p9, %p654_p8 }
  0x9c   : > { %p657_p1 = pnand %p656_p11, %p650_p0 }
  0x9e   : > { %660 = shalt.err (!%p657_p1)
}
  0x9f   : > { %s748_s3 = smov 128   ;;  %s749_s28 = smov 8  }
  0xa0   : > { %473 = dma.vmem_to_hbm [thread:$0]  (%p1015_p10), %s946_s12, 384, %s944_s23, %s950_s30, %s748_s3, %s748_s3, %s749_s28  }
  0xa1 PF: > { %s347_s21 = sand.u32 1, %s712_s9   ;;  %p1016_p3 = scmp.ne.s32.totalorder %s1010_s26, 0 }
  0xa2   : > { %p1017_p7 = scmp.ge.s32.totalorder %s740_s16, 2  ;;  %s348_s17 = scalar_lea.sflag [#allocation4], %s347_s21 }
  0xa4   : > { %p483_p13 = pnand %p1017_p7, %p1016_p3 }
  0xa6   : > { %706 = dma.done.wait (!%p483_p13), %s348_s17, 384  }
  0xa7   : > { %708 = vsyncadd (!%p483_p13), %s348_s17, 4294966912  ;;  %s21_s16 = sadd.s32 1, %s740_s16   ;;  %s1018_s9 = smov %s716_s10 }
  0xa8   : > { %p18_p4 = scmp.ge.s32.totalorder %s21_s16, 4   ;;  %s1019_s10 = smov %s720_s11 }
  0xa9   : > { %s1020_s11 = smov %s823_s24  ;;  %s1021_s12 = smov %s728_s13 }
  0xaa   : > { %s992_s13 = smov 0   ;;  %s1022_s14 = smov %s736_s15 }
  0xab   : > { %s1023_s15 = smov %s1025_s19  ;;  %20 = sbr.rel (!%p18_p4) target bundleno = 9 (0x9), region = 102 }
  0xb2   :  { %353 = vsyncpa [#allocation3], 1 }
  0xb3   :  { %355 = vsyncpa [#allocation3 + $0x1], 1 }
  0xb4   :  { %356 = vsyncpa [#allocation6], 1 }
  0xb5   :  { %358 = vsyncpa [#allocation6 + $0x1], 1 }
  0xb6   :  { %359 = vsyncpa [#allocation4], 1 }
  0xb7   :  { %361 = vsyncpa [#allocation4 + $0x1], 1 }

</bundles_post_ra>
